<compile_context>
chip_gen: v6e
topology: v6e:2x2x1
jax: 0.10.0
libtpu: 0.0.40
codegen_flags: <defaults>
</compile_context>

<pallas_src>
import functools

import jax
import jax.numpy as jnp
from jax import lax
from jax.experimental import pallas as pl
from jax.experimental.pallas import tpu as pltpu

LANES = 128
_MAX_SINGLE_BLOCK_ROWS = 2048   # <= 1 MiB f32 per input -> single grid step
_ROW_TILE = 2048                # large-input tile rows (1 MiB f32 per input tile)
_NUM_CORE_BLOCKS = 2            # outer parallel axis (v7x megacore; serial on 1 TC)


def _mse_combo_small_kernel(x_ref, y_ref, t_ref, o_ref, *, w1, w2, inv_n):
    """Whole problem in one block: direct reduce, no scratch round trip."""
    x = x_ref[...].astype(jnp.float32)
    y = y_ref[...].astype(jnp.float32)
    t = t_ref[...].astype(jnp.float32)
    d1 = x - t          # for mse(input1, target)
    d2 = x - y          # for mse(input1, input2)
    combined = jnp.float32(w1) * (d1 * d1) + jnp.float32(w2) * (d2 * d2)
    o_ref[0] = jnp.sum(combined) * jnp.float32(inv_n)


def _mse_combo_tiled_kernel(x_ref, y_ref, t_ref, o_ref, acc_ref, *,
                            w1, w2, block_rows, tiles_per_core, rows_valid,
                            needs_mask):
    c = pl.program_id(0)   # core-block index (parallel)
    i = pl.program_id(1)   # row-tile index within this core block (reduction)

    @pl.when(i == 0)
    def _():
        acc_ref[...] = jnp.zeros_like(acc_ref)

    # Upcast inside the kernel only (inputs stay in native dtype in HBM).
    x = x_ref[...].astype(jnp.float32)
    y = y_ref[...].astype(jnp.float32)
    t = t_ref[...].astype(jnp.float32)
    d1 = x - t
    d2 = x - y
    combined = jnp.float32(w1) * (d1 * d1) + jnp.float32(w2) * (d2 * d2)

    if needs_mask:
        # Zero rows past the end of the (lane-padded) input; this also zeroes
        # whole redundant tiles whose logical index was clamped in index_map.
        row0 = (c * tiles_per_core + i) * block_rows
        rows = lax.broadcasted_iota(jnp.int32, combined.shape, 0) + row0
        combined = jnp.where(rows < rows_valid, combined, jnp.float32(0.0))

    # Reduce this tile to a single (8,128) vreg with pure VPU adds (the
    # reshape splits the sublane dim on a native-tile boundary, no relayout),
    # then accumulate into the vreg-sized scratch.
    acc_ref[...] += combined.reshape(-1, 8, LANES).sum(axis=0)

    @pl.when(i == tiles_per_core - 1)
    def _():
        o_ref[0] = acc_ref[...]


def mse_loss_pallas(input1, input2, target, w1, w2):
    assert input1.shape == input2.shape == target.shape
    n_elems = int(input1.size)
    w1 = float(w1)
    w2 = float(w2)
    inv_n = 1.0 / n_elems

    # Flatten in native dtype (no copy for contiguous arrays, no cast).
    flats = [input1.reshape(-1), input2.reshape(-1), target.reshape(-1)]

    # Lane alignment only: pad < 128 zeros when n % 128 != 0.  Identical zeros
    # on all three arrays -> padded diffs are 0; we divide by the true n.
    # TODO(synk): for very large lane-misaligned inputs, replace this copy with
    # a separate scalar tail pass to keep the streaming path fully copy-free.
    rem = n_elems % LANES
    if rem:
        flats = [jnp.pad(f, (0, LANES - rem)) for f in flats]

    slabs = [f.reshape(-1, LANES) for f in flats]
    rows = slabs[0].shape[0]

    if rows <= _MAX_SINGLE_BLOCK_ROWS:
        # Small path: one grid step over the full slab, direct scalar output.
        kernel = functools.partial(
            _mse_combo_small_kernel, w1=w1, w2=w2, inv_n=inv_n)
        out = pl.pallas_call(
            kernel,
            out_shape=jax.ShapeDtypeStruct((1,), jnp.float32),
            grid_spec=pltpu.PrefetchScalarGridSpec(
                num_scalar_prefetch=0,
                grid=(1,),
                in_specs=[pl.BlockSpec((rows, LANES), lambda i: (0, 0))] * 3,
                out_specs=pl.BlockSpec(memory_space=pltpu.SMEM),
            ),
            compiler_params=pltpu.CompilerParams(
                dimension_semantics=("arbitrary",)),
        )(*slabs)
        return out[0]

    # Large path: 2048-row tiles, outer parallel axis over core blocks.
    block_rows = _ROW_TILE
    tiles_total = -(-rows // block_rows)
    tiles_per_core = -(-tiles_total // _NUM_CORE_BLOCKS)
    needs_mask = (rows % block_rows != 0) or (
        _NUM_CORE_BLOCKS * tiles_per_core != tiles_total)

    if _NUM_CORE_BLOCKS * tiles_per_core == tiles_total:
        def tile_map(c, i):
            return (c * tiles_per_core + i, 0)
    else:
        def tile_map(c, i):
            # Clamp redundant trailing tiles onto the last valid tile; they are
            # fully zeroed by the in-kernel row mask.
            return (jnp.minimum(c * tiles_per_core + i, tiles_total - 1), 0)

    kernel = functools.partial(
        _mse_combo_tiled_kernel, w1=w1, w2=w2, block_rows=block_rows,
        tiles_per_core=tiles_per_core, rows_valid=rows, needs_mask=needs_mask)

    partials = pl.pallas_call(
        kernel,
        out_shape=jax.ShapeDtypeStruct((_NUM_CORE_BLOCKS, 8, LANES),
                                       jnp.float32),
        grid_spec=pltpu.PrefetchScalarGridSpec(
            num_scalar_prefetch=0,
            grid=(_NUM_CORE_BLOCKS, tiles_per_core),
            in_specs=[pl.BlockSpec((block_rows, LANES), tile_map)] * 3,
            out_specs=pl.BlockSpec((1, 8, LANES), lambda c, i: (c, 0, 0)),
            scratch_shapes=[pltpu.VMEM((8, LANES), jnp.float32)],
        ),
        compiler_params=pltpu.CompilerParams(
            dimension_semantics=("parallel", "arbitrary")),
    )(*slabs)
    # Sum the per-core (8,128) partials and apply the mean scale (true n).
    return jnp.sum(partials) * jnp.float32(inv_n)


if __name__ == "__main__":
    key = jax.random.PRNGKey(0)
    k1, k2, k3 = jax.random.split(key, 3)

    # Small NCHW shapes consistent with a typical conv-feature MSE loss.
    shape = (2, 4, 16, 16)
    input1 = jax.random.normal(k1, shape, dtype=jnp.float32)
    input2 = jax.random.normal(k2, shape, dtype=jnp.float32)
    target = jax.random.normal(k3, shape, dtype=jnp.float32)

    # Deterministic "module parameters" (w1, w2 from __init__).
    w1, w2 = 0.7, 0.3

    loss = mse_loss_pallas(input1, input2, target, w1, w2)
    jax.block_until_ready(loss)

    ref = (w1 * jnp.mean((input1 - target) ** 2)
           + w2 * jnp.mean((input1 - input2) ** 2))
    assert jnp.allclose(loss, ref, rtol=1e-5, atol=1e-6), (loss, ref)

    # Also exercise the tiled (multi-step, masked, 2-core-block) path once.
    shape_big = (8, 16, 48, 48)            # 294,912 elems -> 2304 rows -> 2 tiles
    b1 = jax.random.normal(k1, shape_big, dtype=jnp.float32)
    b2 = jax.random.normal(k2, shape_big, dtype=jnp.float32)
    bt = jax.random.normal(k3, shape_big, dtype=jnp.float32)
    loss_big = mse_loss_pallas(b1, b2, bt, w1, w2)
    jax.block_until_ready(loss_big)
    ref_big = (w1 * jnp.mean((b1 - bt) ** 2) + w2 * jnp.mean((b1 - b2) ** 2))
    assert jnp.allclose(loss_big, ref_big, rtol=1e-4, atol=1e-5), (loss_big, ref_big)

    print("KERNEL_OK")
</pallas_src>

<mosaic_0001>
module attributes {stable_mosaic.version = 11 : i64} {
  func.func @_mse_combo_small_kernel(%arg0: i32, %arg1: memref<16x128xf32, #tpu.memory_space<vmem>>, %arg2: memref<16x128xf32, #tpu.memory_space<vmem>>, %arg3: memref<16x128xf32, #tpu.memory_space<vmem>>, %arg4: memref<1xf32, #tpu.memory_space<smem>>) attributes {dimension_semantics = [#tpu.dimension_semantics<arbitrary>], iteration_bounds = array<i64: 1>, scalar_prefetch = 0 : i64, scratch_operands = 0 : i64, tpu.core_type = #tpu.core_type<tc>, window_params = [{pipeline_mode = #tpu.pipeline_mode<synchronous>, transform_indices = @transform_0, window_bounds = array<i64: 16, 128>}, {pipeline_mode = #tpu.pipeline_mode<synchronous>, transform_indices = @transform_1, window_bounds = array<i64: 16, 128>}, {pipeline_mode = #tpu.pipeline_mode<synchronous>, transform_indices = @transform_2, window_bounds = array<i64: 16, 128>}, {transform_indices = @transform_3, window_bounds = array<i64: 1>}]} {
    %c0 = arith.constant 0 : index
    %c0_0 = arith.constant 0 : index
    %0 = vector.load %arg1[%c0, %c0_0] : memref<16x128xf32, #tpu.memory_space<vmem>>, vector<16x128xf32>
    %c0_1 = arith.constant 0 : index
    %c0_2 = arith.constant 0 : index
    %1 = vector.load %arg2[%c0_1, %c0_2] : memref<16x128xf32, #tpu.memory_space<vmem>>, vector<16x128xf32>
    %c0_3 = arith.constant 0 : index
    %c0_4 = arith.constant 0 : index
    %2 = vector.load %arg3[%c0_3, %c0_4] : memref<16x128xf32, #tpu.memory_space<vmem>>, vector<16x128xf32>
    %3 = arith.subf %0, %2 : vector<16x128xf32>
    %4 = arith.subf %0, %1 : vector<16x128xf32>
    %5 = arith.mulf %3, %3 : vector<16x128xf32>
    %cst = arith.constant 0.699999988 : f32
    %6 = vector.broadcast %cst : f32 to vector<16x128xf32>
    %7 = arith.mulf %6, %5 : vector<16x128xf32>
    %8 = arith.mulf %4, %4 : vector<16x128xf32>
    %cst_5 = arith.constant 3.000000e-01 : f32
    %9 = vector.broadcast %cst_5 : f32 to vector<16x128xf32>
    %10 = arith.mulf %9, %8 : vector<16x128xf32>
    %11 = arith.addf %7, %10 : vector<16x128xf32>
    %12 = vector.shape_cast %11 : vector<16x128xf32> to vector<1x16x128xf32>
    %cst_6 = arith.constant dense<0.000000e+00> : vector<1xf32>
    %13 = vector.multi_reduction <add>, %12, %cst_6 [1, 2] : vector<1x16x128xf32> to vector<1xf32>
    %14 = vector.shape_cast %13 : vector<1xf32> to vector<1x1x1xf32>
    %15 = vector.extract %14[0, 0, 0] : f32 from vector<1x1x1xf32>
    %cst_7 = arith.constant 4.8828125E-4 : f32
    %16 = arith.mulf %15, %cst_7 : f32
    %c0_8 = arith.constant 0 : index
    %17 = memref.load %arg4[%c0_8] : memref<1xf32, #tpu.memory_space<smem>>
    memref.store %16, %arg4[%c0_8] : memref<1xf32, #tpu.memory_space<smem>>
    return
  }
  func.func @transform_0(%arg0: i32) -> (i32, i32) {
    %c0_i32 = arith.constant 0 : i32
    %c0_i32_0 = arith.constant 0 : i32
    %c0_i32_1 = arith.constant 0 : i32
    return %c0_i32, %c0_i32_0 : i32, i32
  }
  func.func @transform_1(%arg0: i32) -> (i32, i32) {
    %c0_i32 = arith.constant 0 : i32
    %c0_i32_0 = arith.constant 0 : i32
    %c0_i32_1 = arith.constant 0 : i32
    return %c0_i32, %c0_i32_0 : i32, i32
  }
  func.func @transform_2(%arg0: i32) -> (i32, i32) {
    %c0_i32 = arith.constant 0 : i32
    %c0_i32_0 = arith.constant 0 : i32
    %c0_i32_1 = arith.constant 0 : i32
    return %c0_i32, %c0_i32_0 : i32, i32
  }
  func.func @transform_3(%arg0: i32) -> i32 {
    %c0_i32 = arith.constant 0 : i32
    %c0_i32_0 = arith.constant 0 : i32
    return %c0_i32 : i32
  }
}

</mosaic_0001>

<bundles_post_ra>
// kernel: tpu_custom_call.1
= control target key start
LH: loop header
LB: loop body
LE: loop exit
PB: predicated region body
PF: predicated region fallthrough
CT: control target
= control target key end

     0   :  { %8 = vsyncpa [#allocation3], 0  ;;  %s224_s0 = inlined_call_operand.hbm [shape: f32[16,128], index: 0, kind: input, shape index: {}]   ;;  %s225_s1 = inlined_call_operand.hbm [shape: f32[16,128], index: 1, kind: input, shape index: {}]   ;;  %s226_s2 = inlined_call_operand.hbm [shape: f32[16,128], index: 2, kind: input, shape index: {}]   ;;  %s227_s3 = inlined_call_operand.hbm [shape: f32[1], index: 3, kind: output, shape index: {}]  }
   0x1   :  { %9 = vsyncpa [#allocation6], 0 }
   0x2   :  { %10 = vsyncpa [#allocation4], 0  ;;  %s186_s12 = smov [#allocation5]   ;;  %s187_s14 = smov [#allocation2]  }
   0x3   :  { %s28_s13 = sshll.u32 %s186_s12, 4  ;;  %s16_s15 = sshll.u32 %s187_s14, 4  ;;  %s29_s13 = int_to_ptr.vmem [resolvable:$true] %s28_s13  ;;  %s17_s15 = int_to_ptr.vmem [resolvable:$true] %s16_s15 }
   0x4   :  { %s120_s16 = scalar_lea.vmem %s29_s13, 256  ;;  %p125_p1 = scmp.lt.s32.totalorder %s29_s13, %s29_s13 }
   0x5   :  { %p121_p0 = scmp.ne.s32.totalorder %s29_s13, %s120_s16  ;;  %p126_p2 = scmp.lt.s32.totalorder %s120_s16, %s120_s16 }
   0x7   :  { %p127_p3 = por %p126_p2, %p125_p1 }
   0x9   :  { %p128_p4 = pnand %p127_p3, %p121_p0 }
   0xb   :  { %131 = shalt.err (!%p128_p4)
}
   0xc   :  { %s188_s17 = smov 128   ;;  %s189_s18 = smov 8  }
   0xd   :  { %34 = dma.hbm_to_vmem [thread:$0]  %s225_s1, 256, %s29_s13, [#allocation6], %s188_s17, %s188_s17, %s189_s18  }
   0xe   :  { %s140_s21 = scalar_lea.vmem %s17_s15, 256  ;;  %p145_p6 = scmp.lt.s32.totalorder %s17_s15, %s17_s15 }
   0xf   :  { %p141_p5 = scmp.ne.s32.totalorder %s17_s15, %s140_s21  ;;  %p146_p7 = scmp.lt.s32.totalorder %s140_s21, %s140_s21 }
  0x11   :  { %p147_p8 = por %p146_p7, %p145_p6 }
  0x13   :  { %p148_p9 = pnand %p147_p8, %p141_p5 }
  0x15   :  { %151 = shalt.err (!%p148_p9)
}
  0x16   :  { %22 = dma.hbm_to_vmem [thread:$0]  %s224_s0, 256, %s17_s15, [#allocation3], %s188_s17, %s188_s17, %s189_s18  }
  0x17   :  { %s190_s24 = smov [#allocation7]  }
  0x18   :  { %s40_s25 = sshll.u32 %s190_s24, 4  ;;  %s41_s25 = int_to_ptr.vmem [resolvable:$true] %s40_s25 }
  0x19   :  { %s160_s26 = scalar_lea.vmem %s41_s25, 256  ;;  %p165_p11 = scmp.lt.s32.totalorder %s41_s25, %s41_s25 }
  0x1a   :  { %p161_p10 = scmp.ne.s32.totalorder %s41_s25, %s160_s26  ;;  %p166_p12 = scmp.lt.s32.totalorder %s160_s26, %s160_s26 }
  0x1c   :  { %p167_p13 = por %p166_p12, %p165_p11 }
  0x1e   :  { %p168_p0 = pnand %p167_p13, %p161_p10 }
  0x20   :  { %171 = shalt.err (!%p168_p0)
}
  0x21   :  { %46 = dma.hbm_to_vmem [thread:$0]  %s226_s2, 256, %s41_s25, [#allocation6], %s188_s17, %s188_s17, %s189_s18  }
  0x22   :  { %180 = dma.done.wait [#allocation3], 256  }
  0x23   :  { %181 = vsyncadd [#allocation3], 4294967040 }
  0x24   :  { %182 = dma.done.wait [#allocation6], 512  }
  0x25   :  { %183 = vsyncadd [#allocation6], 4294966784  ;;  %v56_v0 = vld [vmem:[#allocation2] sm:$0xff]  ;;  %v57_v1 = vld [vmem:[#allocation2 + $0x8] sm:$0xff]  ;;  %s191_s28 = smov [#allocation8]  }
  0x26   :  { %v58_v2 = vld [vmem:[#allocation5] sm:$0xff]  ;;  %v59_v3 = vld [vmem:[#allocation5 + $0x8] sm:$0xff]  ;;  %v60_v4 = vld [vmem:[#allocation7] sm:$0xff] }
  0x27   :  { %v61_v5 = vld [vmem:[#allocation7 + $0x8] sm:$0xff]  ;;  %v64_v6 = vsub.f32 %v56_v0, %v58_v2  ;;  %v62_v7 = vsub.f32 %v56_v0, %v60_v4  ;;  %v65_v9 = vsub.f32 %v57_v1, %v59_v3 }
  0x28   :  { %v63_v8 = vsub.f32 %v57_v1, %v61_v5 }
  0x29   :  { %v70_v10 = vmul.f32 %v64_v6, %v64_v6  ;;  %v66_v11 = vmul.f32 %v62_v7, %v62_v7  ;;  %v71_v13 = vmul.f32 %v65_v9, %v65_v9 }
  0x2a   :  { %v67_v12 = vmul.f32 %v63_v8, %v63_v8 }
  0x2b   :  { %v72_v14 = vmul.f32 0.3, %v70_v10  ;;  %v68_v15 = vmul.f32 0.7, %v66_v11  ;;  %v73_v17 = vmul.f32 0.3, %v71_v13 }
  0x2c   :  { %v69_v16 = vmul.f32 0.7, %v67_v12 }
  0x2d   :  { %v74_v18 = vadd.f32 %v72_v14, %v68_v15 }
  0x2e   :  { %v75_v19 = vadd.f32 %v73_v17, %v69_v16 }
  0x30   :  { %v76_v20 = vadd.f32 %v75_v19, %v74_v18 }
  0x32   :  { %77 = vadd.xlane.f32.xlu0 %v76_v20 }
  0xbb   :  { %v78_v21 = vpop.xlane.xlu0 %77 }
  0xbc   :  { %v79_v22 = vrot.slane %v78_v21, 4 }
  0xbe   :  { %v80_v23 = vadd.f32 %v79_v22, %v78_v21 }
  0xc0   :  { %v81_v24 = vrot.slane %v80_v23, 2 }
  0xc2   :  { %v82_v25 = vadd.f32 %v81_v24, %v80_v23 }
  0xc4   :  { %v83_v26 = vrot.slane %v82_v25, 1 }
  0xc6   :  { %v84_v27 = vadd.f32 %v83_v26, %v82_v25 }
  0xc8   :  { %104 = vpush %v84_v27 }
  0xf9   :  { %s105_s0 = spop %104 }
  0xfa   :  { %s86_s2 = smul.f32 0.00048828125, %s105_s0 }
  0xfc   :  { %88 = sst [smem:[#allocation8]] %s86_s2 }
  0xfd   :  { %96 = dma.smem_to_hbm %s191_s28, 16, %s227_s3, [#allocation4]  }
  0xfe   :  { %184 = dma.done.wait [#allocation4], 16  }
  0xff   :  { %185 = vsyncadd [#allocation4], 4294967280 }
 0x100   :  { %100 = sfence }
 0x101   :  { %101 = vsyncpa [#allocation3], 1 }
 0x102   :  { %102 = vsyncpa [#allocation6], 1 }
 0x103   :  { %103 = vsyncpa [#allocation4], 1 }

</bundles_post_ra>
